<compile_context>
chip_gen: v6e
topology: v6e:2x2x1
jax: 0.10.0
libtpu: 0.0.40
codegen_flags: <defaults>
</compile_context>

<pallas_src>
import jax
import jax.numpy as jnp
from jax import lax
from jax.experimental import pallas as pl
from jax.experimental.pallas import tpu as pltpu


def _cdiv(a, b):
    return -(-a // b)


def _round_up(a, b):
    return _cdiv(a, b) * b


def _vq_kernel(z_ref, wpre_ref, bpre_ref, cnp_ref, cbt_ref, wpost_ref, bpost_ref,
               zcode_ref, zpost_ref, idx_ref):
    """One (batch, packed-column tile) block of the VQ forward pass.

    Packed layout: lane column s' carries k pixels ("slots" j=0..k-1); channel c
    of slot j lives on sublane c*k+j.  All constants are slot-block-diagonal.

    z_ref:     (Din*k, TM)      latent tile
    wpre_ref:  (Dc*k, Din*k)    kron(pre_conv.weight, I_k)
    bpre_ref:  (Dc*k, 1)
    cnp_ref:   (k, K, Dc*k)     per-slot expanded L2-normalized codebook
    cbt_ref:   (Dc, K)          raw codebook, transposed
    wpost_ref: (k, Din*k, Dc)   per-slot expanded post_conv.weight
    bpost_ref: (Din*k, 1)
    zcode_ref: (Dc*k, TM)       z_code (packed)
    zpost_ref: (Din*k, TM)      z_post (packed)
    idx_ref:   (k, TM) int32    code index (packed)
    """
    din_k, tm = z_ref.shape
    num_code = cbt_ref.shape[1]
    k = idx_ref.shape[0]

    z = z_ref[...]
    # ---- pre_conv (1x1 conv == per-pixel channel matmul) ----
    z_code = jnp.dot(wpre_ref[...], z, preferred_element_type=jnp.float32) + bpre_ref[...]
    zcode_ref[...] = z_code.astype(zcode_ref.dtype)

    k_iota = lax.broadcasted_iota(jnp.int32, (num_code, tm), 0)
    z_post = jnp.zeros((din_k, tm), jnp.float32)

    # TODO(synk): for large codebooks (K >= ~512) chunk score/one-hot over K with
    # a running (max, argmax) instead of only capping the tile size.
    for j in range(k):  # static small loop (k <= 8)
        # nearest code for slot j: argmax_m (z_code . c_norm_m)
        # == argmin_m ||z_norm - c_norm_m||^2 (positive per-pixel scaling and the
        # constant +1 terms do not change the argmin).
        score = jnp.dot(cnp_ref[j], z_code, preferred_element_type=jnp.float32)  # (K, TM)
        smax = jnp.max(score, axis=0, keepdims=True)
        # first (smallest) index among maxima == torch.argmin tie-breaking
        idx_j = jnp.min(jnp.where(score == smax, k_iota, num_code),
                        axis=0, keepdims=True)                                   # (1, TM)
        idx_j = jnp.minimum(idx_j, num_code - 1)   # NaN guard: never out of range
        idx_ref[j:j + 1, :] = idx_j

        # gather the raw codebook rows (exact values) via a one-hot matmul
        onehot = (k_iota == idx_j).astype(jnp.float32)                            # (K, TM)
        quant_j = jnp.dot(cbt_ref[...], onehot, preferred_element_type=jnp.float32)  # (Dc, TM)

        # straight-through forward value == quant; post_conv contribution of slot j
        z_post = z_post + jnp.dot(wpost_ref[j], quant_j,
                                  preferred_element_type=jnp.float32)

    zpost_ref[...] = (z_post + bpost_ref[...]).astype(zpost_ref.dtype)


def _choose_tm(cols_min, n_batch, din_k, dc_k, k, num_code, dim_code):
    """Pick the packed-column tile size (multiple of 128)."""
    rp = lambda r: _round_up(r, 8)
    # HBM bytes per packed column (rows sublane-padded to 8, f32/int32)
    bytes_per_col = 4 * (rp(din_k) + rp(dc_k) + rp(din_k) + rp(k))
    # rough per-column VMEM: double-buffered blocks + in-kernel temporaries
    vmem_per_col = 4 * (2 * (rp(din_k) + rp(dc_k) + rp(din_k) + rp(k))
                        + 4 * din_k + dc_k + 4 * num_code + dim_code)
    # target >= ~1.5 MB of HBM traffic per grid step (>> 0.35us step overhead)
    tm = _round_up(max(_cdiv(3 << 20, 2 * bytes_per_col), 512), 128)
    cap = max(128, ((24 << 20) // vmem_per_col) // 128 * 128)   # keep well inside VMEM
    tm = max(128, min(tm, cap, 16384, cols_min))
    steps = lambda t: n_batch * _cdiv(cols_min, t)
    while steps(tm) < 2 and tm >= 256:     # v7x: 2 TensorCores need >= 2 steps
        tm = max(128, (tm // 2) // 128 * 128)
    while steps(tm) < 4 and tm >= 4096:    # and give the DMA pipeline some depth
        tm = (tm // 2) // 128 * 128
    return tm


def vector_quantizer3_forward(z, w_pre, b_pre, codebook, w_post, b_post, *, tm=None):
    """z: (N, dim_latent, H, W). Returns (z_code, z_post, z_quant, z_index).

    Mirrors VectorQuantizer3.forward with use_preconv=True, norm=True.
    """
    N, Din, H, W = z.shape
    K, Dc = codebook.shape
    HW = H * W
    f32 = jnp.float32

    z = z.astype(f32)
    w_pre = w_pre.astype(f32)
    b_pre = b_pre.astype(f32)
    w_post = w_post.astype(f32)
    b_post = b_post.astype(f32)
    codebook = codebook.astype(f32)

    # ---- pack factor: put >= 8 channels on the sublane axis (pure reshape) ----
    k = 1
    while (Din * k) % 8 != 0:
        k *= 2            # terminates: Din*8 is always a multiple of 8
    din_k, dc_k = Din * k, Dc * k

    # ---- packed-column tiling (pad HW up to a multiple of 128*k, lane-dense) ----
    cols_min = _round_up(_cdiv(HW, k), 128)
    if tm is None:
        tm = _choose_tm(cols_min, N, din_k, dc_k, k, K, Dc)
    tm = max(128, _round_up(min(tm, cols_min), 128))
    n_col_tiles = _cdiv(cols_min, tm)
    cols_p = n_col_tiles * tm
    hw_p = cols_p * k

    # ---- pure reshapes (+ zero pad on the flattened spatial axis only) ----
    z3 = z.reshape(N, Din, HW)
    if hw_p != HW:
        z3 = jnp.pad(z3, ((0, 0), (0, 0), (0, hw_p - HW)))
    z_packed = z3.reshape(N, din_k, cols_p)

    # ---- slot-block-diagonal constants, built once in the wrapper ----
    eye_k = jnp.eye(k, dtype=f32)
    eps = 1e-12  # F.normalize default
    cn = codebook / jnp.maximum(
        jnp.sqrt(jnp.sum(codebook * codebook, axis=1, keepdims=True)), eps)   # (K, Dc)
    wpre_p = jnp.einsum('dc,jJ->djcJ', w_pre, eye_k).reshape(dc_k, din_k)
    bpre_p = jnp.repeat(b_pre, k).reshape(dc_k, 1)
    cnp = jnp.einsum('jJ,mc->jmcJ', eye_k, cn).reshape(k, K, dc_k)
    cb_t = jnp.transpose(codebook)                                            # (Dc, K)
    wpost_p = jnp.einsum('ed,jJ->jeJd', w_post, eye_k).reshape(k, din_k, Dc)
    bpost_p = jnp.repeat(b_post, k).reshape(din_k, 1)

    grid = (N, n_col_tiles)
    const = lambda shape: pl.BlockSpec(shape, lambda n, c, _s=len(shape): (0,) * _s)

    out_shapes = (
        jax.ShapeDtypeStruct((N, dc_k, cols_p), f32),      # z_code (packed)
        jax.ShapeDtypeStruct((N, din_k, cols_p), f32),     # z_post (packed)
        jax.ShapeDtypeStruct((N, k, cols_p), jnp.int32),   # index  (packed)
    )

    zc_p, zp_p, idx_p = pl.pallas_call(
        _vq_kernel,
        out_shape=out_shapes,
        grid_spec=pltpu.PrefetchScalarGridSpec(
            num_scalar_prefetch=0,
            grid=grid,
            in_specs=[
                pl.BlockSpec((None, din_k, tm), lambda n, c: (n, 0, c)),
                const((dc_k, din_k)),
                const((dc_k, 1)),
                const((k, K, dc_k)),
                const((Dc, K)),
                const((k, din_k, Dc)),
                const((din_k, 1)),
            ],
            out_specs=[
                pl.BlockSpec((None, dc_k, tm), lambda n, c: (n, 0, c)),
                pl.BlockSpec((None, din_k, tm), lambda n, c: (n, 0, c)),
                pl.BlockSpec((None, k, tm), lambda n, c: (n, 0, c)),
            ],
        ),
        compiler_params=pltpu.CompilerParams(
            dimension_semantics=("parallel", "parallel"),
            vmem_limit_bytes=48 * 1024 * 1024),
    )(z_packed, wpre_p, bpre_p, cnp, cb_t, wpost_p, bpost_p)

    # ---- unpack: pure reshapes + trailing-pad slice (no transposes) ----
    z_code = zc_p.reshape(N, Dc, hw_p)[:, :, :HW].reshape(N, Dc, H, W)
    z_post = zp_p.reshape(N, Din, hw_p)[:, :, :HW].reshape(N, Din, H, W)
    z_index = idx_p.reshape(N, hw_p)[:, :HW].reshape(N, H, W)

    # z_quant is a pure function of the index: reconstruct it outside the kernel
    # (saves ~30% of kernel write traffic); channel axis stays leading, so no
    # lane transpose is needed.
    z_quant = jnp.transpose(jnp.take(cb_t, z_index.reshape(N, HW), axis=1),
                            (1, 0, 2)).reshape(N, Dc, H, W)
    return z_code, z_post, z_quant, z_index


def _reference(z, w_pre, b_pre, codebook, w_post, b_post):
    """Pure-JAX reference mirroring the PyTorch forward (norm=True, use_preconv=True)."""
    N, Din, H, W = z.shape
    Dc = codebook.shape[1]
    zf = jnp.transpose(z, (0, 2, 3, 1)).reshape(-1, Din)
    z_code = zf @ w_pre.T + b_pre
    zn = z_code / jnp.maximum(jnp.linalg.norm(z_code, axis=1, keepdims=True), 1e-12)
    cn = codebook / jnp.maximum(jnp.linalg.norm(codebook, axis=1, keepdims=True), 1e-12)
    d = (jnp.sum(zn ** 2, 1, keepdims=True) + jnp.sum(cn ** 2, 1)[None, :]
         - 2.0 * zn @ cn.T)
    idx = jnp.argmin(d, axis=1)
    quant = codebook[idx]
    z_post = (z_code + (quant - z_code)) @ w_post.T + b_post
    f = lambda a, C: jnp.transpose(a.reshape(N, H, W, C), (0, 3, 1, 2))
    return f(z_code, Dc), f(z_post, Din), f(quant, Dc), idx.reshape(N, H, W)


if __name__ == "__main__":
    # Module config: num_code=16, dim_code=8, dim_latent=4, use_preconv=True, norm=True
    num_code, dim_code, dim_latent = 16, 8, 4

    key = jax.random.PRNGKey(0)
    k_z, k_emb, k_wpre, k_bpre, k_wpost, k_bpost, k_z2 = jax.random.split(key, 7)

    # embedding.weight ~ U(-1/num_code, 1/num_code)
    codebook = jax.random.uniform(k_emb, (num_code, dim_code), jnp.float32,
                                  minval=-1.0 / num_code, maxval=1.0 / num_code)
    # 1x1 conv params (deterministic synthetic init), natural Conv2d orientation
    w_pre = 0.2 * jax.random.normal(k_wpre, (dim_code, dim_latent), jnp.float32)
    b_pre = 0.1 * jax.random.normal(k_bpre, (dim_code,), jnp.float32)
    w_post = 0.2 * jax.random.normal(k_wpost, (dim_latent, dim_code), jnp.float32)
    b_post = 0.1 * jax.random.normal(k_bpost, (dim_latent,), jnp.float32)

    def check(z):
        outs = jax.block_until_ready(
            vector_quantizer3_forward(z, w_pre, b_pre, codebook, w_post, b_post))
        refs = _reference(z, w_pre, b_pre, codebook, w_post, b_post)
        for o, r in zip(outs[:3], refs[:3]):
            assert o.shape == r.shape
            assert jnp.allclose(o, r, atol=1e-5, rtol=1e-5), "mismatch vs reference"
        assert jnp.array_equal(outs[3], refs[3].astype(outs[3].dtype)), \
            "index mismatch vs reference"

    # main case: N=2, C=4, 16x16
    check(jax.random.normal(k_z, (2, dim_latent, 16, 16), jnp.float32))
    # ragged case: exercises the spatial padding path (H*W not a multiple of 128)
    check(jax.random.normal(k_z2, (1, dim_latent, 10, 10), jnp.float32))

    print("KERNEL_OK")
</pallas_src>

<mosaic_0001>
module attributes {stable_mosaic.version = 11 : i64} {
  func.func @_vq_kernel(%arg0: i32, %arg1: i32, %arg2: memref<1x8x128xf32, #tpu.memory_space<vmem>>, %arg3: memref<16x8xf32, #tpu.memory_space<vmem>>, %arg4: memref<16x1xf32, #tpu.memory_space<vmem>>, %arg5: memref<2x16x16xf32, #tpu.memory_space<vmem>>, %arg6: memref<8x16xf32, #tpu.memory_space<vmem>>, %arg7: memref<2x8x8xf32, #tpu.memory_space<vmem>>, %arg8: memref<8x1xf32, #tpu.memory_space<vmem>>, %arg9: memref<1x16x128xf32, #tpu.memory_space<vmem>>, %arg10: memref<1x8x128xf32, #tpu.memory_space<vmem>>, %arg11: memref<1x2x128xi32, #tpu.memory_space<vmem>>) attributes {dimension_semantics = [#tpu.dimension_semantics<parallel>, #tpu.dimension_semantics<parallel>], iteration_bounds = array<i64: 2, 1>, scalar_prefetch = 0 : i64, scratch_operands = 0 : i64, tpu.core_type = #tpu.core_type<tc>, window_params = [{transform_indices = @transform_0, window_bounds = array<i64: 1, 8, 128>}, {pipeline_mode = #tpu.pipeline_mode<synchronous>, transform_indices = @transform_1, window_bounds = array<i64: 16, 8>}, {pipeline_mode = #tpu.pipeline_mode<synchronous>, transform_indices = @transform_2, window_bounds = array<i64: 16, 1>}, {pipeline_mode = #tpu.pipeline_mode<synchronous>, transform_indices = @transform_3, window_bounds = array<i64: 2, 16, 16>}, {pipeline_mode = #tpu.pipeline_mode<synchronous>, transform_indices = @transform_4, window_bounds = array<i64: 8, 16>}, {pipeline_mode = #tpu.pipeline_mode<synchronous>, transform_indices = @transform_5, window_bounds = array<i64: 2, 8, 8>}, {pipeline_mode = #tpu.pipeline_mode<synchronous>, transform_indices = @transform_6, window_bounds = array<i64: 8, 1>}, {transform_indices = @transform_7, window_bounds = array<i64: 1, 16, 128>}, {transform_indices = @transform_8, window_bounds = array<i64: 1, 8, 128>}, {transform_indices = @transform_9, window_bounds = array<i64: 1, 2, 128>}]} {
    %c0 = arith.constant 0 : index
    %c0_0 = arith.constant 0 : index
    %c0_1 = arith.constant 0 : index
    %0 = vector.load %arg2[%c0, %c0_0, %c0_1] : memref<1x8x128xf32, #tpu.memory_space<vmem>>, vector<1x8x128xf32>
    %1 = vector.shape_cast %0 : vector<1x8x128xf32> to vector<8x128xf32>
    %c0_2 = arith.constant 0 : index
    %c0_3 = arith.constant 0 : index
    %2 = vector.load %arg3[%c0_2, %c0_3] : memref<16x8xf32, #tpu.memory_space<vmem>>, vector<16x8xf32>
    %cst = arith.constant dense<0.000000e+00> : vector<16x128xf32>
    %3 = tpu.matmul %2, %1, %cst {dimension_numbers = #tpu.dot_dimension_numbers<[1], [0], [0], [1], [0, 0, 1, 1], [], []>} : vector<16x8xf32>, vector<8x128xf32>, vector<16x128xf32> -> vector<16x128xf32>
    %c0_4 = arith.constant 0 : index
    %c0_5 = arith.constant 0 : index
    %4 = vector.load %arg4[%c0_4, %c0_5] : memref<16x1xf32, #tpu.memory_space<vmem>>, vector<16x1xf32>
    %5 = vector.broadcast %4 : vector<16x1xf32> to vector<16x128xf32>
    %6 = arith.addf %3, %5 : vector<16x128xf32>
    %c0_6 = arith.constant 0 : index
    %c0_7 = arith.constant 0 : index
    %c0_8 = arith.constant 0 : index
    %7 = vector.load %arg9[%c0_6, %c0_7, %c0_8] : memref<1x16x128xf32, #tpu.memory_space<vmem>>, vector<1x16x128xf32>
    %8 = vector.shape_cast %7 : vector<1x16x128xf32> to vector<16x128xf32>
    %9 = vector.shape_cast %6 : vector<16x128xf32> to vector<1x16x128xf32>
    tpu.vector_store %arg9[%c0_6, %c0_7, %c0_8], %9 {strides = array<i32>} : memref<1x16x128xf32, #tpu.memory_space<vmem>>, vector<1x16x128xf32>,
    %10 = tpu.iota {dimensions = array<i32: 0>} : vector<16x128xi32>
    %cst_9 = arith.constant 0.000000e+00 : f32
    %11 = vector.broadcast %cst_9 : f32 to vector<8x128xf32>
    %c0_10 = arith.constant 0 : index
    %c0_11 = arith.constant 0 : index
    %c0_12 = arith.constant 0 : index
    %12 = vector.load %arg5[%c0_10, %c0_11, %c0_12] : memref<2x16x16xf32, #tpu.memory_space<vmem>>, vector<1x16x16xf32>
    %13 = vector.shape_cast %12 : vector<1x16x16xf32> to vector<16x16xf32>
    %cst_13 = arith.constant dense<0.000000e+00> : vector<16x128xf32>
    %14 = tpu.matmul %13, %6, %cst_13 {dimension_numbers = #tpu.dot_dimension_numbers<[1], [0], [0], [1], [0, 0, 1, 1], [], []>} : vector<16x16xf32>, vector<16x128xf32>, vector<16x128xf32> -> vector<16x128xf32>
    %cst_14 = arith.constant dense<0xFF800000> : vector<128xf32>
    %15 = vector.multi_reduction <maximumf>, %14, %cst_14 [0] : vector<16x128xf32> to vector<128xf32>
    %16 = vector.shape_cast %15 : vector<128xf32> to vector<1x128xf32>
    %17 = vector.broadcast %16 : vector<1x128xf32> to vector<16x128xf32>
    %18 = arith.cmpf oeq, %14, %17 : vector<16x128xf32>
    %c16_i32 = arith.constant 16 : i32
    %19 = vector.broadcast %c16_i32 : i32 to vector<16x128xi32>
    %20 = arith.select %18, %10, %19 : vector<16x128xi1>, vector<16x128xi32>
    %cst_15 = arith.constant dense<2147483647> : vector<128xi32>
    %21 = vector.multi_reduction <minsi>, %20, %cst_15 [0] : vector<16x128xi32> to vector<128xi32>
    %22 = vector.shape_cast %21 : vector<128xi32> to vector<1x128xi32>
    %c15_i32 = arith.constant 15 : i32
    %23 = vector.broadcast %c15_i32 : i32 to vector<1x128xi32>
    %24 = arith.minsi %22, %23 : vector<1x128xi32>
    %c0_16 = arith.constant 0 : index
    %c0_17 = arith.constant 0 : index
    %c0_18 = arith.constant 0 : index
    %25 = vector.load %arg11[%c0_16, %c0_17, %c0_18] : memref<1x2x128xi32, #tpu.memory_space<vmem>>, vector<1x1x128xi32>
    %26 = vector.shape_cast %25 : vector<1x1x128xi32> to vector<1x128xi32>
    %27 = vector.shape_cast %24 : vector<1x128xi32> to vector<1x1x128xi32>
    tpu.vector_store %arg11[%c0_16, %c0_17, %c0_18], %27 {strides = array<i32>} : memref<1x2x128xi32, #tpu.memory_space<vmem>>, vector<1x1x128xi32>,
    %28 = vector.broadcast %24 : vector<1x128xi32> to vector<16x128xi32>
    %29 = arith.cmpi eq, %10, %28 : vector<16x128xi32>
    %30 = arith.extui %29 : vector<16x128xi1> to vector<16x128xi32>
    %31 = arith.sitofp %30 : vector<16x128xi32> to vector<16x128xf32>
    %c0_19 = arith.constant 0 : index
    %c0_20 = arith.constant 0 : index
    %32 = vector.load %arg6[%c0_19, %c0_20] : memref<8x16xf32, #tpu.memory_space<vmem>>, vector<8x16xf32>
    %cst_21 = arith.constant dense<0.000000e+00> : vector<8x128xf32>
    %33 = tpu.matmul %32, %31, %cst_21 {dimension_numbers = #tpu.dot_dimension_numbers<[1], [0], [0], [1], [0, 0, 1, 1], [], []>} : vector<8x16xf32>, vector<16x128xf32>, vector<8x128xf32> -> vector<8x128xf32>
    %c0_22 = arith.constant 0 : index
    %c0_23 = arith.constant 0 : index
    %c0_24 = arith.constant 0 : index
    %34 = vector.load %arg7[%c0_22, %c0_23, %c0_24] : memref<2x8x8xf32, #tpu.memory_space<vmem>>, vector<1x8x8xf32>
    %35 = vector.shape_cast %34 : vector<1x8x8xf32> to vector<8x8xf32>
    %cst_25 = arith.constant dense<0.000000e+00> : vector<8x128xf32>
    %36 = tpu.matmul %35, %33, %cst_25 {dimension_numbers = #tpu.dot_dimension_numbers<[1], [0], [0], [1], [0, 0, 1, 1], [], []>} : vector<8x8xf32>, vector<8x128xf32>, vector<8x128xf32> -> vector<8x128xf32>
    %37 = arith.addf %11, %36 : vector<8x128xf32>
    %c1 = arith.constant 1 : index
    %c0_26 = arith.constant 0 : index
    %c0_27 = arith.constant 0 : index
    %38 = vector.load %arg5[%c1, %c0_26, %c0_27] : memref<2x16x16xf32, #tpu.memory_space<vmem>>, vector<1x16x16xf32>
    %39 = vector.shape_cast %38 : vector<1x16x16xf32> to vector<16x16xf32>
    %cst_28 = arith.constant dense<0.000000e+00> : vector<16x128xf32>
    %40 = tpu.matmul %39, %6, %cst_28 {dimension_numbers = #tpu.dot_dimension_numbers<[1], [0], [0], [1], [0, 0, 1, 1], [], []>} : vector<16x16xf32>, vector<16x128xf32>, vector<16x128xf32> -> vector<16x128xf32>
    %cst_29 = arith.constant dense<0xFF800000> : vector<128xf32>
    %41 = vector.multi_reduction <maximumf>, %40, %cst_29 [0] : vector<16x128xf32> to vector<128xf32>
    %42 = vector.shape_cast %41 : vector<128xf32> to vector<1x128xf32>
    %43 = vector.broadcast %42 : vector<1x128xf32> to vector<16x128xf32>
    %44 = arith.cmpf oeq, %40, %43 : vector<16x128xf32>
    %c16_i32_30 = arith.constant 16 : i32
    %45 = vector.broadcast %c16_i32_30 : i32 to vector<16x128xi32>
    %46 = arith.select %44, %10, %45 : vector<16x128xi1>, vector<16x128xi32>
    %cst_31 = arith.constant dense<2147483647> : vector<128xi32>
    %47 = vector.multi_reduction <minsi>, %46, %cst_31 [0] : vector<16x128xi32> to vector<128xi32>
    %48 = vector.shape_cast %47 : vector<128xi32> to vector<1x128xi32>
    %c15_i32_32 = arith.constant 15 : i32
    %49 = vector.broadcast %c15_i32_32 : i32 to vector<1x128xi32>
    %50 = arith.minsi %48, %49 : vector<1x128xi32>
    %c0_33 = arith.constant 0 : index
    %c1_34 = arith.constant 1 : index
    %c0_35 = arith.constant 0 : index
    %51 = vector.load %arg11[%c0_33, %c1_34, %c0_35] : memref<1x2x128xi32, #tpu.memory_space<vmem>>, vector<1x1x128xi32>
    %52 = vector.shape_cast %51 : vector<1x1x128xi32> to vector<1x128xi32>
    %53 = vector.shape_cast %50 : vector<1x128xi32> to vector<1x1x128xi32>
    tpu.vector_store %arg11[%c0_33, %c1_34, %c0_35], %53 {strides = array<i32>} : memref<1x2x128xi32, #tpu.memory_space<vmem>>, vector<1x1x128xi32>,
    %54 = vector.broadcast %50 : vector<1x128xi32> to vector<16x128xi32>
    %55 = arith.cmpi eq, %10, %54 : vector<16x128xi32>
    %56 = arith.extui %55 : vector<16x128xi1> to vector<16x128xi32>
    %57 = arith.sitofp %56 : vector<16x128xi32> to vector<16x128xf32>
    %c0_36 = arith.constant 0 : index
    %c0_37 = arith.constant 0 : index
    %58 = vector.load %arg6[%c0_36, %c0_37] : memref<8x16xf32, #tpu.memory_space<vmem>>, vector<8x16xf32>
    %cst_38 = arith.constant dense<0.000000e+00> : vector<8x128xf32>
    %59 = tpu.matmul %58, %57, %cst_38 {dimension_numbers = #tpu.dot_dimension_numbers<[1], [0], [0], [1], [0, 0, 1, 1], [], []>} : vector<8x16xf32>, vector<16x128xf32>, vector<8x128xf32> -> vector<8x128xf32>
    %c1_39 = arith.constant 1 : index
    %c0_40 = arith.constant 0 : index
    %c0_41 = arith.constant 0 : index
    %60 = vector.load %arg7[%c1_39, %c0_40, %c0_41] : memref<2x8x8xf32, #tpu.memory_space<vmem>>, vector<1x8x8xf32>
    %61 = vector.shape_cast %60 : vector<1x8x8xf32> to vector<8x8xf32>
    %cst_42 = arith.constant dense<0.000000e+00> : vector<8x128xf32>
    %62 = tpu.matmul %61, %59, %cst_42 {dimension_numbers = #tpu.dot_dimension_numbers<[1], [0], [0], [1], [0, 0, 1, 1], [], []>} : vector<8x8xf32>, vector<8x128xf32>, vector<8x128xf32> -> vector<8x128xf32>
    %63 = arith.addf %37, %62 : vector<8x128xf32>
    %c0_43 = arith.constant 0 : index
    %c0_44 = arith.constant 0 : index
    %64 = vector.load %arg8[%c0_43, %c0_44] : memref<8x1xf32, #tpu.memory_space<vmem>>, vector<8x1xf32>
    %65 = vector.broadcast %64 : vector<8x1xf32> to vector<8x128xf32>
    %66 = arith.addf %63, %65 : vector<8x128xf32>
    %c0_45 = arith.constant 0 : index
    %c0_46 = arith.constant 0 : index
    %c0_47 = arith.constant 0 : index
    %67 = vector.load %arg10[%c0_45, %c0_46, %c0_47] : memref<1x8x128xf32, #tpu.memory_space<vmem>>, vector<1x8x128xf32>
    %68 = vector.shape_cast %67 : vector<1x8x128xf32> to vector<8x128xf32>
    %69 = vector.shape_cast %66 : vector<8x128xf32> to vector<1x8x128xf32>
    tpu.vector_store %arg10[%c0_45, %c0_46, %c0_47], %69 {strides = array<i32>} : memref<1x8x128xf32, #tpu.memory_space<vmem>>, vector<1x8x128xf32>,
    return
  }
  func.func @transform_0(%arg0: i32, %arg1: i32) -> (i32, i32, i32) {
    %c0_i32 = arith.constant 0 : i32
    %c0_i32_0 = arith.constant 0 : i32
    return %arg0, %c0_i32, %arg1 : i32, i32, i32
  }
  func.func @transform_1(%arg0: i32, %arg1: i32) -> (i32, i32) {
    %c0_i32 = arith.constant 0 : i32
    %c0_i32_0 = arith.constant 0 : i32
    %c0_i32_1 = arith.constant 0 : i32
    return %c0_i32, %c0_i32_0 : i32, i32
  }
  func.func @transform_2(%arg0: i32, %arg1: i32) -> (i32, i32) {
    %c0_i32 = arith.constant 0 : i32
    %c0_i32_0 = arith.constant 0 : i32
    %c0_i32_1 = arith.constant 0 : i32
    return %c0_i32, %c0_i32_0 : i32, i32
  }
  func.func @transform_3(%arg0: i32, %arg1: i32) -> (i32, i32, i32) {
    %c0_i32 = arith.constant 0 : i32
    %c0_i32_0 = arith.constant 0 : i32
    %c0_i32_1 = arith.constant 0 : i32
    %c0_i32_2 = arith.constant 0 : i32
    return %c0_i32, %c0_i32_0, %c0_i32_1 : i32, i32, i32
  }
  func.func @transform_4(%arg0: i32, %arg1: i32) -> (i32, i32) {
    %c0_i32 = arith.constant 0 : i32
    %c0_i32_0 = arith.constant 0 : i32
    %c0_i32_1 = arith.constant 0 : i32
    return %c0_i32, %c0_i32_0 : i32, i32
  }
  func.func @transform_5(%arg0: i32, %arg1: i32) -> (i32, i32, i32) {
    %c0_i32 = arith.constant 0 : i32
    %c0_i32_0 = arith.constant 0 : i32
    %c0_i32_1 = arith.constant 0 : i32
    %c0_i32_2 = arith.constant 0 : i32
    return %c0_i32, %c0_i32_0, %c0_i32_1 : i32, i32, i32
  }
  func.func @transform_6(%arg0: i32, %arg1: i32) -> (i32, i32) {
    %c0_i32 = arith.constant 0 : i32
    %c0_i32_0 = arith.constant 0 : i32
    %c0_i32_1 = arith.constant 0 : i32
    return %c0_i32, %c0_i32_0 : i32, i32
  }
  func.func @transform_7(%arg0: i32, %arg1: i32) -> (i32, i32, i32) {
    %c0_i32 = arith.constant 0 : i32
    %c0_i32_0 = arith.constant 0 : i32
    return %arg0, %c0_i32, %arg1 : i32, i32, i32
  }
  func.func @transform_8(%arg0: i32, %arg1: i32) -> (i32, i32, i32) {
    %c0_i32 = arith.constant 0 : i32
    %c0_i32_0 = arith.constant 0 : i32
    return %arg0, %c0_i32, %arg1 : i32, i32, i32
  }
  func.func @transform_9(%arg0: i32, %arg1: i32) -> (i32, i32, i32) {
    %c0_i32 = arith.constant 0 : i32
    %c0_i32_0 = arith.constant 0 : i32
    return %arg0, %c0_i32, %arg1 : i32, i32, i32
  }
}

</mosaic_0001>

<bundles_post_ra>
// kernel: tpu_custom_call.1
= control target key start
LH: loop header
LB: loop body
LE: loop exit
PB: predicated region body
PF: predicated region fallthrough
CT: control target
= control target key end

     0   :  { %s1923_s0 = inlined_call_operand.vmem [shape: f32[2,8,128], index: 0, kind: input, shape index: {}]   ;;  %s1924_s1 = inlined_call_operand.vmem [shape: f32[16,8], index: 1, kind: input, shape index: {}]   ;;  %s1925_s2 = inlined_call_operand.vmem [shape: f32[16,1], index: 2, kind: input, shape index: {}]   ;;  %s1926_s3 = inlined_call_operand.vmem [shape: f32[2,16,16], index: 3, kind: input, shape index: {}]   ;;  %s1927_s4 = inlined_call_operand.vmem [shape: f32[8,16], index: 4, kind: input, shape index: {}]   ;;  %s1928_s5 = inlined_call_operand.hbm [shape: f32[2,8,8], index: 5, kind: input, shape index: {}]   ;;  %s1929_s6 = inlined_call_operand.vmem [shape: f32[8,1], index: 6, kind: input, shape index: {}]   ;;  %s1930_s7 = inlined_call_operand.hbm [shape: f32[2,16,128], index: 7, kind: output, shape index: {0}]   ;;  %s1931_s8 = inlined_call_operand.hbm [shape: f32[2,8,128], index: 8, kind: output, shape index: {1}]   ;;  %s1932_s9 = inlined_call_operand.hbm [shape: s32[2,2,128], index: 9, kind: output, shape index: {2}]  }
   0x1   :  { %1934 = sst [smem:[#allocation12_spill]] %s1923_s0 }
   0x2   :  { %1935 = sst [smem:[#allocation13_spill]] %s1924_s1 }
   0x3   :  { %1936 = sst [smem:[#allocation14_spill]] %s1925_s2 }
   0x4   :  { %1937 = sst [smem:[#allocation15_spill]] %s1926_s3 }
   0x5   :  { %1938 = sst [smem:[#allocation16_spill]] %s1927_s4 }
   0x6   :  { %1939 = sst [smem:[#allocation17_spill]] %s1928_s5 }
   0x7   :  { %1940 = sst [smem:[#allocation18_spill]] %s1929_s6 }
   0x8   :  { %15 = vsyncpa [#allocation3], 0 }
   0x9   :  { %16 = vsyncpa [#allocation4], 0 }
   0xa   :  { %18 = vsyncpa [#allocation4 + $0x1], 0 }
   0xb   :  { %19 = vsyncpa [#allocation7], 0 }
   0xc   :  { %21 = vsyncpa [#allocation7 + $0x1], 0  ;;  %s1647_s30 = smov 0   ;;  %s1649_s10 = smov 0  }
   0xd   :  { %s1651_s11 = smov 0   ;;  %s1653_s12 = smov 0  }
   0xe   :  { %s1655_s13 = smov 0   ;;  %s1657_s14 = smov 0  }
   0xf LB: > { %s1678_s15 = sadd.s32 4294967295, %s1583_s14   ;;  %s1933_s16 = sadd.s32 4294967294, %s1583_s14   ;;  %s1583_s14 = sphi %s1657_s14, %s27_s14   ;;  %s1579_s13 = sphi %s1655_s13, %s1957_s13   ;;  %s1575_s12 = sphi %s1653_s12, %s1956_s12   ;;  %s1571_s11 = sphi %s1651_s11, %s1955_s11   ;;  %s1567_s10 = sphi %s1649_s10, %s1954_s10   ;;  %s1563_s30 = sphi %s1647_s30, %s1953_s30  }
  0x10   : > { %s39_s17 = sadd.s32 1, %s1579_s13  ;;  %s202_s18 = sadd.s32 1, %s1571_s11 }
  0x11   : > { %p41_p0 = scmp.ge.s32.totalorder %s39_s17, 2  ;;  %p212_p1 = scmp.ne.s32.totalorder %s1571_s11, %s1567_s10 }
  0x12   : > { %p213_p2 = scmp.eq.s32.totalorder %s1678_s15, 1  ;;  %p218_p3 = scmp.ne.s32.totalorder %s1567_s10, %s1563_s30 }
  0x13   : > { %s1959_s17 = smov (%p41_p0, %s39_s17), 0  ;;  %p219_p5 = scmp.eq.s32.totalorder %s1933_s16, 1 }
  0x14   : > { %p1690_p4 = por %p213_p2, %p212_p1  ;;  %s197_s20 = ssub.s32 %s1579_s13, %s1959_s17 }
  0x15   : > { %p1232_p6 = scmp.ge.s32.totalorder %s1583_s14, 1  ;;  %p200_p7 = scmp.eq.s32.totalorder %s197_s20, 0 }
  0x16   : > { %p1699_p8 = por %p219_p5, %p218_p3  ;;  %p282_p9 = scmp.lt.s32.totalorder %s1583_s14, 3 }
  0x17   : > { %s1705_s22 = scalar_select %p200_p7, %s1571_s11, %s202_s18  }
  0x18   : > { %p1707_p10 = pnand %p1232_p6, %p282_p9  ;;  %p1359_p11 = scmp.eq.s32.totalorder %s1678_s15, 0 }
  0x19   : > { %s1585_s24 = smov [#allocation2]  }
  0x1a   : > { %p1345_p12 = pneg %p1707_p10  ;;  %s306_s25 = sshll.u32 %s1585_s24, 4  ;;  %s307_s25 = int_to_ptr.vmem [resolvable:$true] %s306_s25 }
  0x1b   : > { %s1432_s26 = scalar_lea.vmem %s307_s25, 256  ;;  %p1440_p5 = scmp.lt.s32.totalorder %s307_s25, %s307_s25 }
  0x1c   : > { %p1346_p13 = pnand %p1359_p11, %p1345_p12  ;;  %p1433_p1 = scmp.ne.s32.totalorder %s307_s25, %s1432_s26 }
  0x1d   : > { %p1441_p7 = scmp.lt.s32.totalorder %s1432_s26, %s1432_s26 }
  0x1e   : > { %p1423_p0 = pneg %p1346_p13 }
  0x1f   : > { %p1442_p6 = por %p1441_p7, %p1440_p5 }
  0x20   : > { %p1435_p2 = pnand %p1433_p1, %p1423_p0 }
  0x22   : > { %p1436_p3 = pneg %p1435_p2 }
  0x24   : > { %p1443_p9 = pnand %p1442_p6, %p1436_p3 }
  0x26   : > { %1446 = shalt.err (!%p1443_p9)
}
  0x27   : > { %s1586_s27 = smov 128   ;;  %s1587_s28 = smov 8  }
  0x28   : > { %s1944_s5 = sld [smem:[#allocation17_spill]] }
  0x2a   : > { %335 = sbr.rel (%p1707_p10) target bundleno = 917 (0x395), region = 48 }
  0x2e   : > { %1348 = dma.hbm_to_vmem [thread:$0]  (!%p1346_p13), %s1944_s5, 256, %s307_s25, [#allocation3], %s1586_s27, %s1586_s27, %s1587_s28  }
  0x2f   : > { %1550 = dma.done.wait (%p1359_p11), [#allocation3], 256  }
  0x30   : > { %1552 = vsyncadd (%p1359_p11), [#allocation3], 4294967040  ;;  %p383_p12 = scmp.lt.s32.totalorder %s1575_s12, 1  ;;  %v1588_v0 = vmov 0   ;;  %s1945_s0 = sld [smem:[#allocation12_spill]]  ;;  %vm405_vm0 = vcmask 64512   ;;  %v489_v22 = vlaneseq }
  0x31   : > { %1419 = vset.pattern.permute.xlu0 %v1588_v0  ;;  %1420 = vset.pattern.permute.xlu1 %v1588_v0  ;;  %s1946_s1 = sld [smem:[#allocation13_spill]]  ;;  %vm494_vm1 = vcmask 130048   ;;  %s1749_s23 = sand.u32 1, %s1567_s10   ;;  %v1589_v16 = vmov 0.0   ;;  %vm1590_vm2 = vmmov 0   ;;  %v1591_v56 = vmov 1.0  }
  0x32   : > { %s384_s20 = scalar_select %p383_p12, %s1575_s12, 1  ;;  %v1774_v28 = vshrl.u32 %v489_v22, 7  ;;  %v681_v61 = vld [vmem:[#allocation2] sm:$0xff]  ;;  %v872_v0 = vld [vmem:[#allocation2 + $0x8] sm:$0xff] }
  0x33   : > { %s1947_s2 = sld [smem:[#allocation14_spill]]  ;;  %s1237_s16 = sshll.u32 %s1749_s23, 4 }
  0x34   : > { %s1240_s24 = sshll.u32 %s384_s20, 3  ;;  %s1948_s3 = sld [smem:[#allocation15_spill]]  ;;  %v491_v33 = vadd.s32 8, %v1774_v28 }
  0x35   : > { %s1752_s27 = scalar_lea.vmem [#allocation5], %s1237_s16  ;;  %s1949_s4 = sld [smem:[#allocation16_spill]] }
  0x36   : > { %s389_s25 = scalar_lea.vmem %s1945_s0, %s1240_s24  ;;  %s1950_s6 = sld [smem:[#allocation18_spill]] }
  0x37   : > { %v390_v1 = vld [vmem:[%s389_s25] sm:$0xff]  ;;  %v392_v3 = vld [vmem:[%s1946_s1 + $0x8] sm:$0xff]  ;;  %s1239_s25 = sshll.u32 %s1749_s23, 1  ;;  %s1270_s26 = sshll.u32 %s1575_s12, 8 }
  0x38   : > { %v391_v2 = vld [vmem:[%s1946_s1] sm:$0xff]  ;;  %1292 = vmatprep.subr.mxu0 %v390_v1  ;;  %s1780_s16 = scalar_lea.vmem [#allocation8], %s1239_s25  ;;  %s1808_s28 = scalar_lea.hbm %s1930_s7, %s1270_s26 }
  0x39   : > { %1294 = vmatprep.mubr.msk.f32.mxu0 %vm405_vm0, %v391_v2  ;;  %v394_v4 = vld [vmem:[%s1947_s2 + $0x8] sm:$0xff]  ;;  %1293 = vmatpush3.msra.mxu0 %v390_v1  ;;  %v393_v5 = vld [vmem:[%s1947_s2] sm:$0xff]  ;;  %s1052_s18 = sshll.u32 %s1752_s27, 4  ;;  %s1592_s0 = smov [#allocation5]   ;;  %s1811_s18 = int_to_ptr.vmem [resolvable:$true] %s1052_s18 }
  0x3a   : > { %402 = vperm.xlu0 %1419, %v394_v4   ;;  %1295 = vmatmul.mubr.msk.f32.vlgmr.msra.gmra.mxu0 %vm405_vm0, %v392_v3  ;;  %v492_v6 = vld [vmem:[%s1948_s3] sm:$0xff]  ;;  %v493_v13 = vld [vmem:[%s1948_s3 + $0x8] sm:$0xff]  ;;  %v1250_v14 = vld [vmem:[%s1948_s3 + $0x10] sm:$0xff]  ;;  %s1447_s24 = scalar_lea.vmem %s1811_s18, 256  ;;  %s1451_s1 = sshll.u32 %s1592_s0, 4  ;;  %s1452_s1 = int_to_ptr.vmem [resolvable:$false] %s1451_s1 }
  0x3b   : > { %1301 = vmatprep.mubr.msk.f32.mxu1 %vm494_vm1, %v492_v6  ;;  %v1251_v15 = vld [vmem:[%s1948_s3 + $0x18] sm:$0xff]  ;;  %1304 = vmatprep.subr.mxu0 %v1589_v16  ;;  %v607_v57 = vld [vmem:[%s1949_s4] sm:$0xff]  ;;  %p1448_p10 = scmp.ne.s32.totalorder %s1811_s18, %s1447_s24  ;;  %s1453_s2 = scalar_lea.vmem %s1452_s1, 512 }
  0x3c   : > { %1308 = vmatprep.mubr.msk.f32.mxu0 %vm1590_vm2, %v1589_v16  ;;  %v1019_v60 = vld [vmem:[%s1950_s6] sm:$0xff]  ;;  %p1454_p0 = scmp.lt.s32.totalorder %s1811_s18, %s1452_s1  ;;  %p1455_p1 = scmp.lt.s32.totalorder %s1453_s2, %s1447_s24 }
  0x3d   : > { %1022 = vperm.xlu1 %1420, %v1019_v60   ;;  %p1449_p11 = pnand %p1448_p10, %p1690_p4 }
  0x3e   : > { %397 = vperm.xlu0 %1419, %v393_v5   ;;  %p1456_p2 = por %p1455_p1, %p1454_p0 }
  0x3f   : > { %p1450_p13 = pneg %p1449_p11 }
  0x41   : > { %p1457_p3 = pnand %p1456_p2, %p1450_p13 }
  0xb5   : > { %v403_v7 = vpop.permute.xlu0 %402 }
  0xb9   : > { %v398_v10 = vpop.permute.xlu0 %397 }
  0xfa   : > { %v1296_v8 = vpop.f32.mrf.mxu0 }
  0xfb   : > { %v484_v9 = vadd.f32 %v1296_v8, %v403_v7 }
  0xfc   : > { %v478_v11 = vpop.f32.mrf.mxu0 }
  0xfd   : > { %v479_v12 = vadd.f32 %v478_v11, %v398_v10  ;;  %1297 = vmatprep.subr.mxu1 %v484_v9  ;;  %488 = vst [vmem:[%s1752_s27 + $0x8] sm:$0xff] %v484_v9 }
  0xfe   : > { %1298 = vmatpush3.msra.mxu1 %v484_v9 }
  0xff   : > { %1299 = vmatprep.subr.mxu1 %v479_v12  ;;  %487 = vst [vmem:[%s1752_s27] sm:$0xff] %v479_v12 }
 0x100   : > { %1300 = vmatpush3.msra.mxu1 %v479_v12 }
 0x101   : > { %1302 = vmatmul.mubr.msk.f32.vlgmr.msra.gmra.mxu1 %vm494_vm1, %v493_v13  ;;  %1311 = vmatprep.subr.mxu1 %v484_v9 }
 0x102   : > { %1312 = vmatpush3.msra.mxu1 %v484_v9  ;;  %1315 = vmatprep.mubr.msk.f32.mxu1 %vm494_vm1, %v1250_v14 }
 0x103   : > { %1313 = vmatprep.subr.mxu1 %v479_v12 }
 0x104   : > { %1314 = vmatpush3.msra.mxu1 %v479_v12 }
 0x105   : > { %1316 = vmatmul.mubr.msk.f32.vlgmr.msra.gmra.mxu1 %vm494_vm1, %v1251_v15  ;;  %1325 = vmatprep.subr.mxu1 %v1589_v16 }
 0x106   : > { %1327 = vmatprep.mubr.msk.f32.mxu1 %vm1590_vm2, %v1589_v16 }
 0x1c1   : > { %v1303_v17 = vpop.f32.mrf.mxu1 }
 0x1c3   : > { %v567_v18 = vpop.f32.mrf.mxu1 }
 0x1c4   : > { %v576_v19 = vmax.f32 %v567_v18, %v1303_v17 }
 0x1c5   : > { %v1317_v20 = vpop.f32.mrf.mxu1 }
 0x1c6   : > { %v577_v21 = vrot.slane %v576_v19, 4 }
 0x1c7   : > { %v757_v23 = vpop.f32.mrf.mxu1 }
 0x1c8   : > { %v578_v24 = vmax.f32 %v576_v19, %v577_v21  ;;  %v766_v25 = vmax.f32 %v757_v23, %v1317_v20 }
 0x1ca   : > { %v579_v26 = vrot.slane %v578_v24, 2  ;;  %v767_v27 = vrot.slane %v766_v25, 4 }
 0x1cc   : > { %v580_v29 = vmax.f32 %v578_v24, %v579_v26  ;;  %v768_v30 = vmax.f32 %v766_v25, %v767_v27 }
 0x1ce   : > { %v581_v31 = vrot.slane %v580_v29, 1  ;;  %v769_v32 = vrot.slane %v768_v30, 2 }
 0x1d0   : > { %v582_v34 = vmax.f32 %v580_v29, %v581_v31  ;;  %v770_v35 = vmax.f32 %v768_v30, %v769_v32 }
 0x1d2   : > { %vm583_vm3 = vcmp.eq.f32.partialorder %v567_v18, %v582_v34  ;;  %vm584_vm4 = vcmp.eq.f32.partialorder %v1303_v17, %v582_v34  ;;  %v771_v36 = vrot.slane %v770_v35, 1 }
 0x1d3   : > { %v585_v37 = vsel %vm583_vm3, %v1774_v28, 16  ;;  %v586_v38 = vsel %vm584_vm4, %v491_v33, 16 }
 0x1d4   : > { %vm587_vm5 = vcmp.lt.s32.totalorder %v585_v37, %v586_v38  ;;  %v772_v39 = vmax.f32 %v770_v35, %v771_v36 }
 0x1d5   : > { %v588_v40 = vsel %vm587_vm5, %v585_v37, %v586_v38 }
 0x1d6   : > { %v589_v41 = vrot.slane %v588_v40, 4  ;;  %vm773_vm6 = vcmp.eq.f32.partialorder %v757_v23, %v772_v39  ;;  %vm774_vm7 = vcmp.eq.f32.partialorder %v1317_v20, %v772_v39 }
 0x1d7   : > { %v775_v42 = vsel %vm773_vm6, %v1774_v28, 16  ;;  %v776_v43 = vsel %vm774_vm7, %v491_v33, 16 }
 0x1d8   : > { %vm590_vm8 = vcmp.lt.s32.totalorder %v588_v40, %v589_v41  ;;  %vm777_vm9 = vcmp.lt.s32.totalorder %v775_v42, %v776_v43 }
 0x1d9   : > { %v591_v44 = vsel %vm590_vm8, %v588_v40, %v589_v41  ;;  %v778_v45 = vsel %vm777_vm9, %v775_v42, %v776_v43 }
 0x1da   : > { %v592_v46 = vrot.slane %v591_v44, 2  ;;  %v779_v47 = vrot.slane %v778_v45, 4 }
 0x1dc   : > { %vm593_vm10 = vcmp.lt.s32.totalorder %v591_v44, %v592_v46  ;;  %vm780_vm11 = vcmp.lt.s32.totalorder %v778_v45, %v779_v47 }
 0x1dd   : > { %v594_v48 = vsel %vm593_vm10, %v591_v44, %v592_v46  ;;  %v781_v49 = vsel %vm780_vm11, %v778_v45, %v779_v47 }
 0x1de   : > { %v595_v50 = vrot.slane %v594_v48, 1  ;;  %v782_v51 = vrot.slane %v781_v49, 2 }
 0x1e0   : > { %vm783_vm12 = vcmp.lt.s32.totalorder %v781_v49, %v782_v51  ;;  %vm596_vm13 = vcmp.lt.s32.totalorder %v594_v48, %v595_v50 }
 0x1e1   : > { %v784_v52 = vsel %vm783_vm12, %v781_v49, %v782_v51  ;;  %v597_v53 = vsel %vm596_vm13, %v594_v48, %v595_v50 }
 0x1e2   : > { %v785_v54 = vrot.slane %v784_v52, 1  ;;  %vm598_vm14 = vcmp.lt.s32.totalorder %v597_v53, 15 }
 0x1e3   : > { %v599_v55 = vsel %vm598_vm14, %v597_v53, 15 }
 0x1e4   : > { %600 = vst [vmem:[%s1780_s16] sm:$0x1] %v599_v55  ;;  %vm602_vm15 = vcmp.eq.s32.totalorder %v491_v33, %v599_v55  ;;  %vm786_vm3 = vcmp.lt.s32.totalorder %v784_v52, %v785_v54  ;;  %vm601_vm4 = vcmp.eq.s32.totalorder %v1774_v28, %v599_v55 }
 0x1e5   : > { %1305 = vmatpush3.msk.msra.mxu0 %vm602_vm15, %v1591_v56  ;;  %v787_v58 = vsel %vm786_vm3, %v784_v52, %v785_v54 }
 0x1e6   : > { %1306 = vmatprep.subr.mxu0 %v1589_v16  ;;  %vm788_vm5 = vcmp.lt.s32.totalorder %v787_v58, 15 }
 0x1e7   : > { %1307 = vmatpush3.msk.msra.mxu0 %vm601_vm4, %v1591_v56  ;;  %v789_v59 = vsel %vm788_vm5, %v787_v58, 15 }
 0x1e8   : > { %1309 = vmatmul.mubr.msk.f32.vlgmr.msra.gmra.mxu0 %vm494_vm1, %v607_v57  ;;  %1318 = vmatprep.subr.mxu0 %v1589_v16  ;;  %790 = vst [vmem:[%s1780_s16 + $0x1] sm:$0x1] %v789_v59  ;;  %vm792_vm6 = vcmp.eq.s32.totalorder %v491_v33, %v789_v59  ;;  %vm791_vm7 = vcmp.eq.s32.totalorder %v1774_v28, %v789_v59 }
 0x1e9   : > { %1319 = vmatpush3.msk.msra.mxu0 %vm792_vm6, %v1591_v56  ;;  %1322 = vmatprep.mubr.msk.f32.mxu0 %vm1590_vm2, %v1589_v16 }
 0x1ea   : > { %1320 = vmatprep.subr.mxu0 %v1589_v16 }
 0x1eb   : > { %1321 = vmatpush3.msk.msra.mxu0 %vm791_vm7, %v1591_v56 }
 0x1ec   : > { %1323 = vmatmul.mubr.msk.f32.vlgmr.msra.gmra.mxu0 %vm494_vm1, %v607_v57  ;;  %1330 = vmatprep.subr.mxu0 %v1589_v16 }
 0x1ed   : > { %1332 = vmatprep.mubr.msk.f32.mxu0 %vm1590_vm2, %v1589_v16 }
 0x2a8   : > { %v677_v62 = vpop.f32.mrf.mxu0 }
 0x2a9   : > { %1331 = vmatpush3.msra.mxu0 %v677_v62 }
 0x2aa   : > { %v1310_v63 = vpop.f32.mrf.mxu0  ;;  %1333 = vmatmul.mubr.msk.f32.vlgmr.msra.gmra.mxu0 %vm405_vm0, %v681_v61 }
 0x2ac   : > { %v867_v1 = vpop.f32.mrf.mxu0 }
 0x2ad   : > { %1326 = vmatpush3.msra.mxu1 %v867_v1 }
 0x2ae   : > { %v1324_v2 = vpop.f32.mrf.mxu0  ;;  %1328 = vmatmul.mubr.msk.f32.vlgmr.msra.gmra.mxu1 %vm405_vm0, %v872_v0 }
 0x2af   : > { %1460 = shalt.err (!%p1457_p3)
}
 0x2b0   : > { %s1461_s27 = scalar_lea.hbm %s1808_s28, 256  ;;  %s1465_s0 = scalar_lea.hbm %s1930_s7, 512 }
 0x2b1   : > { %p1462_p5 = scmp.ne.s32.totalorder %s1808_s28, %s1461_s27  ;;  %p1466_p9 = scmp.lt.s32.totalorder %s1808_s28, %s1930_s7 }
 0x2b2   : > { %p1467_p12 = scmp.lt.s32.totalorder %s1465_s0, %s1461_s27 }
 0x2b3   : > { %p1463_p7 = pnand %p1462_p5, %p1690_p4 }
 0x2b4   : > { %p1468_p10 = por %p1467_p12, %p1466_p9 }
 0x2b5   : > { %p1464_p6 = pneg %p1463_p7 }
 0x2b7   : > { %p1469_p11 = pnand %p1468_p10, %p1464_p6 }
 0x2b9   : > { %1472 = shalt.err (!%p1469_p11)
}
 0x2ba   : > { %s1593_s1 = smov 128   ;;  %s1594_s2 = smov 8   ;;  %v1023_v6 = vpop.permute.xlu1 %1022 }
 0x2bb   : > { %s1951_s24 = scalar_lea.sflag [#allocation4], %s1749_s23  ;;  %s1238_s20 = sshll.u32 %s1749_s23, 3 }
 0x2bc   : > { %1339 = dma.vmem_to_hbm [thread:$0]  (%p1690_p4), %s1811_s18, 256, %s1808_s28, %s1951_s24, %s1593_s1, %s1593_s1, %s1594_s2  }
 0x2bd   : > { %s1032_s27 = sand.u32 1, %s1678_s15   ;;  %s1266_s26 = sshll.u32 %s1575_s12, 7 }
 0x2be   : > { %s375_s29 = scalar_lea.vmem [#allocation6], %s1238_s20  ;;  %s1267_s25 = sshll.u32 %s1575_s12, 5 }
 0x2bf   : > { %s1069_s0 = sshll.u32 %s375_s29, 4  ;;  %s1083_s3 = sshll.u32 %s1780_s16, 4  ;;  %s1846_s0 = int_to_ptr.vmem [resolvable:$true] %s1069_s0  ;;  %s1853_s3 = int_to_ptr.vmem [resolvable:$true] %s1083_s3 }
 0x2c0   : > { %s1844_s6 = scalar_lea.hbm %s1931_s8, %s1266_s26  ;;  %s1851_s28 = scalar_lea.hbm %s1932_s9, %s1267_s25 }
 0x2c1   : > { %s1855_s12 = scalar_lea.sflag [#allocation7], %s1032_s27  ;;  %s1473_s16 = scalar_lea.vmem %s1846_s0, 128 }
 0x2c2   : > { %p1474_p13 = scmp.ne.s32.totalorder %s1846_s0, %s1473_s16  ;;  %s1595_s4 = smov [#allocation6]  }
 0x2c3   : > { %s1477_s5 = sshll.u32 %s1595_s4, 4  ;;  %s1478_s5 = int_to_ptr.vmem [resolvable:$false] %s1477_s5 }
 0x2c4   : > { %p1475_p0 = pnand %p1474_p13, %p1690_p4  ;;  %s1479_s18 = scalar_lea.vmem %s1478_s5, 256 }
 0x2c5   : > { %p1480_p2 = scmp.lt.s32.totalorder %s1846_s0, %s1478_s5  ;;  %p1481_p3 = scmp.lt.s32.totalorder %s1479_s18, %s1473_s16 }
 0x2c6   : > { %p1476_p1 = pneg %p1475_p0 }
 0x2c7   : > { %p1482_p5 = por %p1481_p3, %p1480_p2 }
 0x2c9   : > { %p1483_p7 = pnand %p1482_p5, %p1476_p1 }
 0x36a   : > { %v1015_v3 = vpop.f32.mrf.mxu0 }
 0x36c   : > { %v1334_v4 = vpop.f32.mrf.mxu0 }
 0x36e   : > { %v942_v5 = vpop.f32.mrf.mxu1 }
 0x36f   : > { %v1016_v7 = vadd.f32 %v1015_v3, %v942_v5 }
 0x370   : > { %v1329_v8 = vpop.f32.mrf.mxu1 }
 0x371   : > { %v1025_v9 = vadd.f32 %v1023_v6, %v1016_v7 }
 0x373   : > { %1026 = vst [vmem:[%s375_s29] sm:$0xff] %v1025_v9 }
 0x374   : > { %1486 = shalt.err (!%p1483_p7)
}
 0x375   : > { %s1487_s1 = scalar_lea.hbm %s1844_s6, 128  ;;  %s1491_s20 = scalar_lea.hbm %s1931_s8, 256 }
 0x376   : > { %p1488_p6 = scmp.ne.s32.totalorder %s1844_s6, %s1487_s1  ;;  %p1492_p10 = scmp.lt.s32.totalorder %s1844_s6, %s1931_s8 }
 0x377   : > { %p1493_p11 = scmp.lt.s32.totalorder %s1491_s20, %s1487_s1 }
 0x378   : > { %p1489_p9 = pnand %p1488_p6, %p1690_p4 }
 0x379   : > { %p1494_p13 = por %p1493_p11, %p1492_p10 }
 0x37a   : > { %p1490_p12 = pneg %p1489_p9 }
 0x37c   : > { %p1495_p0 = pnand %p1494_p13, %p1490_p12 }
 0x37e   : > { %1498 = shalt.err (!%p1495_p0)
}
 0x37f   : > { %1340 = dma.vmem_to_hbm [thread:$0]  (%p1690_p4), %s1846_s0, 128, %s1844_s6, %s1855_s12  }
 0x380   : > { %s1499_s29 = scalar_lea.vmem %s1853_s3, 32  ;;  %s1596_s25 = smov [#allocation8]  }
 0x381   : > { %p1500_p1 = scmp.ne.s32.totalorder %s1853_s3, %s1499_s29  ;;  %s1503_s23 = sshll.u32 %s1596_s25, 4  ;;  %s1504_s23 = int_to_ptr.vmem [resolvable:$false] %s1503_s23 }
 0x382   : > { %s1505_s15 = scalar_lea.vmem %s1504_s23, 64  ;;  %p1506_p5 = scmp.lt.s32.totalorder %s1853_s3, %s1504_s23 }
 0x383   : > { %p1501_p2 = pnand %p1500_p1, %p1690_p4  ;;  %p1507_p7 = scmp.lt.s32.totalorder %s1505_s15, %s1499_s29 }
 0x385   : > { %p1502_p3 = pneg %p1501_p2  ;;  %p1508_p6 = por %p1507_p7, %p1506_p5 }
 0x387   : > { %p1509_p9 = pnand %p1508_p6, %p1502_p3 }
 0x389   : > { %1512 = shalt.err (!%p1509_p9)
}
 0x38a   : > { %s1513_s16 = scalar_lea.hbm %s1851_s28, 32  ;;  %s1517_s4 = scalar_lea.hbm %s1932_s9, 64 }
 0x38b   : > { %p1514_p12 = scmp.ne.s32.totalorder %s1851_s28, %s1513_s16  ;;  %p1518_p13 = scmp.lt.s32.totalorder %s1851_s28, %s1932_s9 }
 0x38c   : > { %p1519_p0 = scmp.lt.s32.totalorder %s1517_s4, %s1513_s16 }
 0x38d   : > { %p1515_p10 = pnand %p1514_p12, %p1690_p4 }
 0x38e   : > { %p1520_p1 = por %p1519_p0, %p1518_p13 }
 0x38f   : > { %p1516_p11 = pneg %p1515_p10 }
 0x391   : > { %p1521_p2 = pnand %p1520_p1, %p1516_p11 }
 0x393   : > { %1524 = shalt.err (!%p1521_p2)
}
 0x394   : > { %1341 = dma.vmem_to_hbm [thread:$0]  (%p1690_p4), %s1853_s3, 32, %s1851_s28, %s1855_s12  }
 0x395 PF: > { %p1361_p3 = scmp.ge.s32.totalorder %s1583_s14, 2  ;;  %s1095_s1 = sand.u32 1, %s1563_s30  }
 0x396   : > { %s1096_s2 = scalar_lea.sflag [#allocation4], %s1095_s1 }
 0x397   : > { %p1350_p5 = pnand %p1361_p3, %p1699_p8 }
 0x399   : > { %p1351_p7 = pneg %p1350_p5 }
 0x39b   : > { %1554 = dma.done.wait (%p1351_p7), %s1096_s2, 256  }
 0x39c   : > { %1556 = vsyncadd (%p1351_p7), %s1096_s2, 4294967040  ;;  %s1952_s24 = sadd.s32 4294967294, %s1583_s14  }
 0x39d   : > { %s1104_s20 = sand.u32 1, %s1952_s24  }
 0x39e   : > { %s1105_s19 = scalar_lea.sflag [#allocation7], %s1104_s20 }
 0x39f   : > { %1558 = dma.done.wait (%p1351_p7), %s1105_s19, 160  }
 0x3a0   : > { %1560 = vsyncadd (%p1351_p7), %s1105_s19, 4294967136  ;;  %s27_s14 = sadd.s32 1, %s1583_s14   ;;  %s1953_s30 = smov %s1567_s10 }
 0x3a1   : > { %p24_p4 = scmp.ge.s32.totalorder %s27_s14, 4   ;;  %s1954_s10 = smov %s1571_s11 }
 0x3a2   : > { %s1955_s11 = smov %s1705_s22  ;;  %s1956_s12 = smov %s1579_s13 }
 0x3a3   : > { %s1957_s13 = smov %s1959_s17  ;;  %26 = sbr.rel (!%p24_p4) target bundleno = 15 (0xf), region = 122 }
 0x3a8   :  { %1119 = vsyncpa [#allocation3], 1 }
 0x3a9   :  { %1121 = vsyncpa [#allocation3 + $0x1], 1 }
 0x3aa   :  { %1122 = vsyncpa [#allocation4], 1 }
 0x3ab   :  { %1124 = vsyncpa [#allocation4 + $0x1], 1 }
 0x3ac   :  { %1125 = vsyncpa [#allocation7], 1 }
 0x3ad   :  { %1127 = vsyncpa [#allocation7 + $0x1], 1 }

</bundles_post_ra>
